<compile_context>
chip_gen: v5e
topology: v5e:2x2
jax: 0.10.0
libtpu: 0.0.40
codegen_flags: <defaults>
</compile_context>

<pallas_src>
import functools

import jax
import jax.numpy as jnp
from jax.experimental import pallas as pl
from jax.experimental.pallas import tpu as pltpu


def _divisor_tile(n, align, cap):
    """Largest multiple of `align` that divides n (capped at `cap`); else n (full dim)."""
    if n % align != 0:
        return n  # Pallas allows full-extent blocks even if unaligned
    t = min(n, (cap // align) * align)
    while t >= align:
        if n % t == 0:
            return t
        t -= align
    return n


def _pos_enc_add_kernel(x_ref, w_ref, o_ref):
    # x_ref: (bm, bn), w_ref: (1, bn) -> broadcast add over rows.
    o_ref[...] = x_ref[...] + w_ref[...]


def _pos_enc_dropout_kernel(x_ref, w_ref, r_ref, o_ref, *, threshold, scale):
    # Inverted dropout with integer-domain keep test: keep iff bits >= p*2^32.
    y = x_ref[...] + w_ref[...]
    keep = r_ref[...] >= jnp.uint32(threshold)
    o_ref[...] = jnp.where(keep, y * jnp.asarray(scale, dtype=y.dtype),
                           jnp.zeros_like(y))


def learned_positional_encoding(x, weight, *, dropout_p=0.1, training=False,
                                rng_key=None):
    """x: (B, S, H); weight: (num_embeddings, H). Returns dropout(x + weight[:S])."""
    B, S, H = x.shape
    D = S * H

    # Lane-dense flattened views (glue stays in plain JAX).
    x2 = x.reshape(B, D)
    w2 = weight[:S, :].astype(x.dtype).reshape(1, D)

    # Tile sizes: lane dim a multiple of 128 dividing D (else full D), sublane
    # dim a multiple of 8 dividing B (else full B); capped for VMEM budget.
    bm = _divisor_tile(B, 8, 256)
    bn = _divisor_tile(D, 128, 2048)
    grid = (D // bn, B // bm)  # columns outer, rows inner -> weight stays resident

    x_spec = pl.BlockSpec((bm, bn), lambda j, i: (i, j))
    w_spec = pl.BlockSpec((1, bn), lambda j, i: (0, j))
    o_spec = pl.BlockSpec((bm, bn), lambda j, i: (i, j))
    out_shape = jax.ShapeDtypeStruct((B, D), x.dtype)
    cparams = pltpu.CompilerParams(
        dimension_semantics=("parallel", "parallel"),
        vmem_limit_bytes=32 * 1024 * 1024,
    )

    p = float(dropout_p)
    if (not training) or p <= 0.0:
        # Eval mode: dropout is identity.
        out2 = pl.pallas_call(
            _pos_enc_add_kernel,
            out_shape=out_shape,
            grid=grid,
            in_specs=[x_spec, w_spec],
            out_specs=o_spec,
            compiler_params=cparams,
        )(x2, w2)
        return out2.reshape(B, S, H)

    if p >= 1.0:
        # torch.nn.Dropout(p=1.0) zeroes the output; avoid 1/(1-p) blowup.
        return jnp.zeros_like(x)

    if rng_key is None:
        rng_key = jax.random.PRNGKey(0)
    # Random bits drawn from the JAX PRNG outside the kernel (portable across
    # real TPU and interpret mode; no pltpu.prng_seed dependency).
    rbits = jax.random.bits(rng_key, (B, D), dtype=jnp.uint32)
    threshold = min(int(round(p * 4294967296.0)), 4294967295)
    scale = 1.0 / (1.0 - p)
    kernel = functools.partial(_pos_enc_dropout_kernel,
                               threshold=threshold, scale=scale)
    out2 = pl.pallas_call(
        kernel,
        out_shape=out_shape,
        grid=grid,
        in_specs=[x_spec, w_spec, x_spec],
        out_specs=o_spec,
        compiler_params=cparams,
    )(x2, w2, rbits)
    return out2.reshape(B, S, H)


def init_weight(key, num_embeddings, hidden_dim):
    # xavier_normal_: std = sqrt(2 / (fan_in + fan_out))
    std = (2.0 / (num_embeddings + hidden_dim)) ** 0.5
    return std * jax.random.normal(key, (num_embeddings, hidden_dim),
                                   dtype=jnp.float32)


if __name__ == "__main__":
    key = jax.random.PRNGKey(0)
    k_x, k_w, k_d = jax.random.split(key, 3)

    batch, seq_len, hidden_dim = 2, 8, 32
    num_embeddings = 50

    x = jax.random.normal(k_x, (batch, seq_len, hidden_dim), dtype=jnp.float32)
    weight = init_weight(k_w, num_embeddings, hidden_dim)

    # Eval-mode forward (dropout = identity), matching model.eval() in PyTorch.
    out = learned_positional_encoding(x, weight, dropout_p=0.1, training=False)
    out = jax.block_until_ready(out)

    ref = x + weight[:seq_len, :][None, :, :]
    assert out.shape == (batch, seq_len, hidden_dim)
    assert jnp.allclose(out, ref, atol=1e-6, rtol=1e-6), "eval mismatch vs reference"

    # Training-mode forward (stochastic inverted dropout): every element must be
    # either exactly 0 (dropped) or ref / (1 - p) (kept).
    out_train = learned_positional_encoding(
        x, weight, dropout_p=0.1, training=True, rng_key=k_d)
    out_train = jax.block_until_ready(out_train)
    scale = 1.0 / (1.0 - 0.1)
    kept_or_dropped = jnp.isclose(out_train, ref * scale, atol=1e-5) | (out_train == 0.0)
    assert bool(jnp.all(kept_or_dropped)), "train-mode dropout structure mismatch"

    print("KERNEL_OK")
</pallas_src>

<mosaic_0001>
module attributes {stable_mosaic.version = 11 : i64} {
  func.func @_pos_enc_add_kernel(%arg0: i32, %arg1: i32, %arg2: memref<2x256xf32, #tpu.memory_space<vmem>>, %arg3: memref<1x256xf32, #tpu.memory_space<vmem>>, %arg4: memref<2x256xf32, #tpu.memory_space<vmem>>) attributes {dimension_semantics = [#tpu.dimension_semantics<parallel>, #tpu.dimension_semantics<parallel>], iteration_bounds = array<i64: 1, 1>, scalar_prefetch = 0 : i64, scratch_operands = 0 : i64, tpu.core_type = #tpu.core_type<tc>, window_params = [{transform_indices = @transform_0, window_bounds = array<i64: 2, 256>}, {transform_indices = @transform_1, window_bounds = array<i64: 1, 256>}, {transform_indices = @transform_2, window_bounds = array<i64: 2, 256>}]} {
    %c0 = arith.constant 0 : index
    %c0_0 = arith.constant 0 : index
    %0 = vector.load %arg2[%c0, %c0_0] : memref<2x256xf32, #tpu.memory_space<vmem>>, vector<2x256xf32>
    %c0_1 = arith.constant 0 : index
    %c0_2 = arith.constant 0 : index
    %1 = vector.load %arg3[%c0_1, %c0_2] : memref<1x256xf32, #tpu.memory_space<vmem>>, vector<1x256xf32>
    %2 = vector.broadcast %1 : vector<1x256xf32> to vector<2x256xf32>
    %3 = arith.addf %0, %2 : vector<2x256xf32>
    %c0_3 = arith.constant 0 : index
    %c0_4 = arith.constant 0 : index
    %4 = vector.load %arg4[%c0_3, %c0_4] : memref<2x256xf32, #tpu.memory_space<vmem>>, vector<2x256xf32>
    tpu.vector_store %arg4[%c0_3, %c0_4], %3 {strides = array<i32>} : memref<2x256xf32, #tpu.memory_space<vmem>>, vector<2x256xf32>,
    return
  }
  func.func @transform_0(%arg0: i32, %arg1: i32) -> (i32, i32) {
    %c0_i32 = arith.constant 0 : i32
    return %arg1, %arg0 : i32, i32
  }
  func.func @transform_1(%arg0: i32, %arg1: i32) -> (i32, i32) {
    %c0_i32 = arith.constant 0 : i32
    %c0_i32_0 = arith.constant 0 : i32
    return %c0_i32, %arg0 : i32, i32
  }
  func.func @transform_2(%arg0: i32, %arg1: i32) -> (i32, i32) {
    %c0_i32 = arith.constant 0 : i32
    return %arg1, %arg0 : i32, i32
  }
}

</mosaic_0001>

<bundles_post_ra>
// kernel: tpu_custom_call.1
= control target key start
LH: loop header
LB: loop body
LE: loop exit
PB: predicated region body
PF: predicated region fallthrough
CT: control target
= control target key end

     0   :  { %7 = vsyncpa [#allocation3], 0  ;;  %s177_s0 = inlined_call_operand.hbm [shape: f32[2,256], index: 0, kind: input, shape index: {}]   ;;  %s178_s1 = inlined_call_operand.hbm [shape: f32[1,256], index: 1, kind: input, shape index: {}]   ;;  %s179_s2 = inlined_call_operand.hbm [shape: f32[2,256], index: 2, kind: output, shape index: {}]  }
   0x1   :  { %8 = vsyncpa [#allocation6], 0 }
   0x2   :  { %9 = vsyncpa [#allocation4], 0  ;;  %s15_s11 = sshll.u32 %s177_s0, 4  ;;  %s150_s12 = smov [#allocation2]   ;;  %s16_s11 = int_to_ptr.hbm [resolvable:$true] %s15_s11 }
   0x3   :  { %s17_s13 = sshll.u32 %s150_s12, 4  ;;  %s26_s16 = sshll.u32 %s178_s1, 4  ;;  %s18_s13 = int_to_ptr.vmem [resolvable:$true] %s17_s13  ;;  %s27_s16 = int_to_ptr.hbm [resolvable:$true] %s26_s16 }
   0x4   :  { %20 = dma.hbm_to_vmem [thread:$0]  %s16_s11, 64, %s18_s13, [#allocation3]  }
   0x5   :  { %s151_s17 = smov [#allocation5]  }
   0x6   :  { %s28_s18 = sshll.u32 %s151_s17, 4  ;;  %s29_s18 = int_to_ptr.vmem [resolvable:$true] %s28_s18 }
   0x7   :  { %31 = dma.hbm_to_vmem [thread:$0]  %s27_s16, 32, %s29_s18, [#allocation6]  }
   0x8   :  { %144 = dma.done.wait [#allocation3], 64  }
   0x9   :  { %145 = vsyncadd [#allocation3], 4294967232 }
   0xa   :  { %146 = dma.done.wait [#allocation6], 32  }
   0xb   :  { %147 = vsyncadd [#allocation6], 4294967264  ;;  %v41_v0 = vld [vmem:[#allocation5] sm:$0x3]  ;;  %vm46_vm0 = vcmask 1041408   ;;  %s152_s0 = smov [#allocation7]  }
   0xc   :  { %v43_v1 = vperm.slane %v41_v0, 0  ;;  %v44_v2 = vperm.slane %v41_v0, 1  ;;  %v40_v3 = vld [vmem:[#allocation2] sm:$0xf]  ;;  %s56_s19 = sshll.u32 %s152_s0, 4  ;;  %s58_s21 = sshll.u32 %s179_s2, 4  ;;  %s57_s19 = int_to_ptr.vmem [resolvable:$true] %s56_s19  ;;  %s59_s21 = int_to_ptr.hbm [resolvable:$true] %s58_s21 }
   0xe   :  { %v45_v4 = vrot.slane %v44_v2, 6 }
  0x10   :  { %v47_v5 = vsel %vm46_vm0, %v43_v1, %v45_v4 }
  0x11   :  { %v49_v6 = vadd.f32 %v47_v5, %v40_v3 }
  0x13   :  { %50 = vst [vmem:[#allocation7] sm:$0xf] %v49_v6 }
  0x14   :  { %61 = dma.vmem_to_hbm [thread:$0]  %s57_s19, 64, %s59_s21, [#allocation4]  }
  0x15   :  { %148 = dma.done.wait [#allocation4], 64  }
  0x16   :  { %149 = vsyncadd [#allocation4], 4294967232 }
  0x17   :  { %66 = vsyncpa [#allocation3], 1 }
  0x18   :  { %67 = vsyncpa [#allocation6], 1 }
  0x19   :  { %68 = vsyncpa [#allocation4], 1 }

</bundles_post_ra>
